<compile_context>
chip_gen: v6e
topology: v6e:2x2x1
jax: 0.10.0
libtpu: 0.0.40
codegen_flags: <defaults>
</compile_context>

<pallas_src>
import functools
import math

import jax
import jax.numpy as jnp
from jax.experimental import pallas as pl
from jax.experimental.pallas import tpu as pltpu


# ------------------------------ tiling helper ------------------------------ #
def _tile(dim, pref, align):
    """Largest tile <= pref that divides dim and is a multiple of `align`.

    Falls back to the full extent (always a legal block) only when no aligned
    divisor exists, instead of whenever `pref` does not divide `dim`.
    """
    if dim <= pref:
        return dim
    if dim % pref == 0:
        return pref
    best = dim  # full extent fallback
    d = align
    while d <= pref:
        if dim % d == 0:
            best = d
        d += align
    # TODO(synk): a cdiv grid with edge masking would avoid the full-extent
    # fallback for dims with no aligned divisor at all.
    return best


_VMEM_LIMIT = 48 * 1024 * 1024  # > v5e 16 MiB scoped default, < v7x 64 MiB physical


# ------------------------------ tiled linear ------------------------------- #
def _linear_kernel(x_ref, w_ref, b_ref, o_ref, acc_ref, *, k_axis):
    # x: (tm, tk), w: (tk, tn), b: (1, tn), o: (tm, tn); K is the last grid axis.
    @pl.when(pl.program_id(k_axis) == 0)
    def _init():
        acc_ref[...] = jnp.zeros_like(acc_ref)

    # bf16 MXU operands, f32 accumulation (no-op cast when already bf16).
    acc_ref[...] += jnp.dot(x_ref[...].astype(jnp.bfloat16),
                            w_ref[...].astype(jnp.bfloat16),
                            preferred_element_type=jnp.float32)

    @pl.when(pl.program_id(k_axis) == pl.num_programs(k_axis) - 1)
    def _finalize():
        o_ref[...] = (acc_ref[...] + b_ref[...].astype(jnp.float32)
                      ).astype(o_ref.dtype)


def linear(x2d, w, b, *, out_dtype=None, tm=512, tn=512, tk=512):
    """y = x2d @ w + b, with w stored as (K, N)."""
    M, K = x2d.shape
    N = w.shape[1]
    out_dtype = x2d.dtype if out_dtype is None else out_dtype
    tm, tn, tk = _tile(M, tm, 8), _tile(N, tn, 128), _tile(K, tk, 128)
    grid = (M // tm, N // tn, K // tk)
    return pl.pallas_call(
        functools.partial(_linear_kernel, k_axis=2),
        out_shape=jax.ShapeDtypeStruct((M, N), out_dtype),
        grid=grid,
        in_specs=[
            pl.BlockSpec((tm, tk), lambda i, j, k: (i, k)),
            pl.BlockSpec((tk, tn), lambda i, j, k: (k, j)),
            pl.BlockSpec((1, tn), lambda i, j, k: (0, j)),
        ],
        out_specs=pl.BlockSpec((tm, tn), lambda i, j, k: (i, j)),
        scratch_shapes=[pltpu.VMEM((tm, tn), jnp.float32)],
        compiler_params=pltpu.CompilerParams(
            dimension_semantics=("parallel", "parallel", "arbitrary"),
            vmem_limit_bytes=_VMEM_LIMIT),
    )(x2d, w, b.reshape(1, N))


def qkv_linear(x2d, w3, b3, *, out_dtype, tm=512, tn=512, tk=512):
    """Fused qkv projection.

    w3: (3, K, E), b3: (3, 1, E) -> output (3, M, E): q / k / v as three
    contiguous planes (contiguous DMAs in the attention kernel for any E).
    """
    M, K = x2d.shape
    N = w3.shape[2]
    tm, tn, tk = _tile(M, tm, 8), _tile(N, tn, 128), _tile(K, tk, 128)
    grid = (M // tm, 3, N // tn, K // tk)
    return pl.pallas_call(
        functools.partial(_linear_kernel, k_axis=3),
        out_shape=jax.ShapeDtypeStruct((3, M, N), out_dtype),
        grid=grid,
        in_specs=[
            pl.BlockSpec((tm, tk), lambda i, t, j, k: (i, k)),
            pl.BlockSpec((None, tk, tn), lambda i, t, j, k: (t, k, j)),
            pl.BlockSpec((None, 1, tn), lambda i, t, j, k: (t, 0, j)),
        ],
        out_specs=pl.BlockSpec((None, tm, tn), lambda i, t, j, k: (t, i, j)),
        scratch_shapes=[pltpu.VMEM((tm, tn), jnp.float32)],
        compiler_params=pltpu.CompilerParams(
            dimension_semantics=("parallel", "parallel", "parallel", "arbitrary"),
            vmem_limit_bytes=_VMEM_LIMIT),
    )(x2d, w3, b3)


# --------------------- flash-style multi-head attention -------------------- #
def _flash_mha_kernel(q_ref, k_ref, v_ref, o_ref, q_sc, m_sc, l_sc, acc_sc):
    # q_ref: (tq, H, hd), k_ref/v_ref: (tkv, H, hd), o_ref: (tq, E) lane-dense.
    # Scratch persists across the kv grid axis:
    #   q_sc (H, tq, hd) head-major q (computed once per q tile; scale already
    #   folded into the qkv weights), m/l (H, tq, 1), acc (H, tq, hd).
    ki = pl.program_id(2)
    tq, H, hd = q_ref.shape

    @pl.when(ki == 0)
    def _init():
        q_sc[...] = jnp.swapaxes(q_ref[...], 0, 1)        # hoisted XLU transpose
        m_sc[...] = jnp.full_like(m_sc, -jnp.inf)
        l_sc[...] = jnp.zeros_like(l_sc)
        acc_sc[...] = jnp.zeros_like(acc_sc)

    # Head-major k/v for batched MXU einsums (all heads in one grid step).
    k = jnp.swapaxes(k_ref[...], 0, 1)                    # (H, tkv, hd)
    v = jnp.swapaxes(v_ref[...], 0, 1)                    # (H, tkv, hd)

    s = jnp.einsum("hqd,hkd->hqk", q_sc[...], k,
                   preferred_element_type=jnp.float32)    # (H, tq, tkv)
    # TODO(synk): mask=None path only; masked_fill would slot in here.
    m_new = jnp.maximum(m_sc[...], s.max(axis=-1, keepdims=True))
    alpha = jnp.exp(m_sc[...] - m_new)
    p = jnp.exp(s - m_new)
    l_sc[...] = alpha * l_sc[...] + p.sum(axis=-1, keepdims=True)
    acc_sc[...] = alpha * acc_sc[...] + jnp.einsum(
        "hqk,hkd->hqd", p.astype(v.dtype), v, preferred_element_type=jnp.float32)
    m_sc[...] = m_new

    # TODO(synk): Dropout(0.3) on attention weights omitted (eval/inference
    # semantics); training parity would use pltpu.prng_seed / prng_random_bits.
    @pl.when(ki == pl.num_programs(2) - 1)
    def _finalize():
        out = acc_sc[...] * pl.reciprocal(l_sc[...], approx=True)  # (H, tq, hd)
        # Merge heads inside the kernel -> lane-dense (tq, E) store.
        o_ref[...] = (jnp.swapaxes(out, 0, 1)
                      .reshape(tq, H * hd).astype(o_ref.dtype))


def flash_mha(qkv, *, tq=128, tkv=512):
    """qkv: (3, B, S, H, hd) -> attention output (B, S, E) (heads merged)."""
    _, B, S, H, hd = qkv.shape
    E = H * hd
    # tq=128 / tkv=512 in bf16 is the safe cross-generation default (fits v7x's
    # 64 MiB VMEM); v5e/v6e can raise tq to cut K/V HBM re-reads at long S.
    tq, tkv = _tile(S, tq, 8), _tile(S, tkv, 8)
    grid = (B, S // tq, S // tkv)
    return pl.pallas_call(
        _flash_mha_kernel,
        out_shape=jax.ShapeDtypeStruct((B, S, E), qkv.dtype),
        grid=grid,
        in_specs=[
            # q / k / v read from contiguous planes of the (3, B, S, H, hd) buffer.
            pl.BlockSpec((None, None, tq, H, hd),
                         lambda b, qi, ki: (0, b, qi, 0, 0)),
            pl.BlockSpec((None, None, tkv, H, hd),
                         lambda b, qi, ki: (1, b, ki, 0, 0)),
            pl.BlockSpec((None, None, tkv, H, hd),
                         lambda b, qi, ki: (2, b, ki, 0, 0)),
        ],
        out_specs=pl.BlockSpec((None, tq, E), lambda b, qi, ki: (b, qi, 0)),
        scratch_shapes=[
            pltpu.VMEM((H, tq, hd), qkv.dtype),    # head-major q (hoisted)
            pltpu.VMEM((H, tq, 1), jnp.float32),   # running max
            pltpu.VMEM((H, tq, 1), jnp.float32),   # running denom
            pltpu.VMEM((H, tq, hd), jnp.float32),  # running numerator
        ],
        compiler_params=pltpu.CompilerParams(
            dimension_semantics=("parallel", "parallel", "arbitrary"),
            vmem_limit_bytes=_VMEM_LIMIT),
    )(qkv, qkv, qkv)


# --------------------------------- module ---------------------------------- #
def init_params(key, embed_size):
    k1, k2, k3, k4 = jax.random.split(key, 4)
    # PyTorch Linear weight is (out, in); we store the transpose (in, out).
    return {
        "qkv_w": jax.random.normal(k1, (embed_size, 3 * embed_size), jnp.float32) * 0.05,
        "qkv_b": jax.random.normal(k2, (3 * embed_size,), jnp.float32) * 0.05,
        "fc_w": jax.random.normal(k3, (embed_size, embed_size), jnp.float32) * 0.05,
        "fc_b": jax.random.normal(k4, (embed_size,), jnp.float32) * 0.05,
    }


def multi_head_attention(x, params, num_heads):
    B, S, E = x.shape
    H = num_heads
    hd = E // H
    inv_scale = 1.0 / math.sqrt(hd)

    # One-time weight-side transforms (O(E*3E), negligible vs. activations):
    #  * permute qkv columns so the projection output is (3, B*S, H*hd):
    #    head split + q/k/v split become free reshapes and each of q/k/v is a
    #    contiguous plane (contiguous attention DMAs),
    #  * fold the 1/sqrt(hd) attention scale into the q weights/bias
    #    (zero in-kernel cost),
    #  * cast weights to bf16 for the MXU (f32 accumulation kept in-kernel).
    w3 = params["qkv_w"].reshape(E, H, 3, hd).transpose(2, 0, 1, 3)  # (3, E, H, hd)
    w3 = w3.at[0].multiply(inv_scale).reshape(3, E, E).astype(jnp.bfloat16)
    b3 = params["qkv_b"].reshape(H, 3, hd).transpose(1, 0, 2)        # (3, H, hd)
    b3 = b3.at[0].multiply(inv_scale).reshape(3, 1, E)               # f32 bias

    qkv = qkv_linear(x.reshape(B * S, E), w3, b3,
                     out_dtype=jnp.bfloat16)                         # (3, B*S, E)
    qkv = qkv.reshape(3, B, S, H, hd)                                # free reshape

    attn = flash_mha(qkv)                                            # (B, S, E) bf16

    out = linear(attn.reshape(B * S, E),
                 params["fc_w"].astype(jnp.bfloat16), params["fc_b"],
                 out_dtype=x.dtype)
    return out.reshape(B, S, E)


# ---------------------------- pure-JAX reference ---------------------------- #
def reference(x, params, num_heads):
    B, S, E = x.shape
    hd = E // num_heads
    qkv = x @ params["qkv_w"] + params["qkv_b"]
    qkv = qkv.reshape(B, S, num_heads, 3 * hd)
    q, k, v = jnp.split(qkv, 3, axis=-1)
    q, k, v = (t.transpose(0, 2, 1, 3) for t in (q, k, v))
    scores = jnp.einsum("bhqd,bhkd->bhqk", q, k) / jnp.sqrt(jnp.float32(hd))
    w = jax.nn.softmax(scores, axis=-1)
    o = jnp.einsum("bhqk,bhkd->bhqd", w, v)
    o = o.transpose(0, 2, 1, 3).reshape(B, S, E)
    return o @ params["fc_w"] + params["fc_b"]


if __name__ == "__main__":
    B, S, E, H = 2, 8, 32, 4
    key = jax.random.PRNGKey(0)
    kx, kp = jax.random.split(key)
    x = jax.random.normal(kx, (B, S, E), jnp.float32)
    params = init_params(kp, E)

    mha = jax.jit(multi_head_attention, static_argnums=2)
    out = jax.block_until_ready(mha(x, params, H))

    ref = reference(x, params, H)
    assert out.shape == (B, S, E), out.shape
    # Tolerance accounts for bf16 MXU operands / bf16 intermediate activations
    # and the approximate (EUP) softmax reciprocal; accumulation stays f32.
    max_err = float(jnp.max(jnp.abs(out - ref)))
    assert jnp.allclose(out, ref, atol=2e-2, rtol=2e-2), f"mismatch: {max_err}"
    print("KERNEL_OK")
</pallas_src>

<mosaic_0001>
module attributes {stable_mosaic.version = 11 : i64} {
  func.func @_linear_kernel(%arg0: i32, %arg1: i32, %arg2: i32, %arg3: i32, %arg4: memref<16x32xf32, #tpu.memory_space<vmem>>, %arg5: memref<1x32x32xbf16, #tpu.memory_space<vmem>>, %arg6: memref<1x1x32xf32, #tpu.memory_space<vmem>>, %arg7: memref<1x16x32xbf16, #tpu.memory_space<vmem>>, %arg8: memref<16x32xf32, #tpu.memory_space<vmem>>) attributes {dimension_semantics = [#tpu.dimension_semantics<parallel>, #tpu.dimension_semantics<parallel>, #tpu.dimension_semantics<parallel>, #tpu.dimension_semantics<arbitrary>], iteration_bounds = array<i64: 1, 3, 1, 1>, scalar_prefetch = 0 : i64, scratch_operands = 1 : i64, tpu.core_type = #tpu.core_type<tc>, window_params = [{transform_indices = @transform_0, window_bounds = array<i64: 16, 32>}, {transform_indices = @transform_1, window_bounds = array<i64: 1, 32, 32>}, {transform_indices = @transform_2, window_bounds = array<i64: 1, 1, 32>}, {transform_indices = @transform_3, window_bounds = array<i64: 1, 16, 32>}]} {
    %c0_i32 = arith.constant 0 : i32
    %0 = arith.cmpi eq, %arg3, %c0_i32 : i32
    %1 = arith.extui %0 : i1 to i32
    %c0_i32_0 = arith.constant 0 : i32
    %2 = arith.cmpi ne, %1, %c0_i32_0 : i32
    scf.if %2 {
      %cst_11 = arith.constant 0.000000e+00 : f32
      %14 = vector.broadcast %cst_11 : f32 to vector<16x32xf32>
      %c0_12 = arith.constant 0 : index
      %c0_13 = arith.constant 0 : index
      %15 = vector.load %arg8[%c0_12, %c0_13] : memref<16x32xf32, #tpu.memory_space<vmem>>, vector<16x32xf32>
      tpu.vector_store %arg8[%c0_12, %c0_13], %14 {strides = array<i32>} : memref<16x32xf32, #tpu.memory_space<vmem>>, vector<16x32xf32>,
    } else {
    }
    %c0 = arith.constant 0 : index
    %c0_1 = arith.constant 0 : index
    %3 = vector.load %arg8[%c0, %c0_1] : memref<16x32xf32, #tpu.memory_space<vmem>>, vector<16x32xf32>
    %c0_2 = arith.constant 0 : index
    %c0_3 = arith.constant 0 : index
    %4 = vector.load %arg4[%c0_2, %c0_3] : memref<16x32xf32, #tpu.memory_space<vmem>>, vector<16x32xf32>
    %5 = arith.truncf %4 : vector<16x32xf32> to vector<16x32xbf16>
    %c0_4 = arith.constant 0 : index
    %c0_5 = arith.constant 0 : index
    %c0_6 = arith.constant 0 : index
    %6 = vector.load %arg5[%c0_4, %c0_5, %c0_6] : memref<1x32x32xbf16, #tpu.memory_space<vmem>>, vector<1x32x32xbf16>
    %7 = vector.shape_cast %6 : vector<1x32x32xbf16> to vector<32x32xbf16>
    %cst = arith.constant dense<0.000000e+00> : vector<16x32xf32>
    %8 = tpu.matmul %5, %7, %cst {dimension_numbers = #tpu.dot_dimension_numbers<[1], [0], [0], [1], [0, 0, 1, 1], [], []>} : vector<16x32xbf16>, vector<32x32xbf16>, vector<16x32xf32> -> vector<16x32xf32>
    %9 = arith.addf %3, %8 : vector<16x32xf32>
    %c0_7 = arith.constant 0 : index
    %c0_8 = arith.constant 0 : index
    %10 = vector.load %arg8[%c0_7, %c0_8] : memref<16x32xf32, #tpu.memory_space<vmem>>, vector<16x32xf32>
    tpu.vector_store %arg8[%c0_7, %c0_8], %9 {strides = array<i32>} : memref<16x32xf32, #tpu.memory_space<vmem>>, vector<16x32xf32>,
    %c0_i32_9 = arith.constant 0 : i32
    %11 = arith.cmpi eq, %arg3, %c0_i32_9 : i32
    %12 = arith.extui %11 : i1 to i32
    %c0_i32_10 = arith.constant 0 : i32
    %13 = arith.cmpi ne, %12, %c0_i32_10 : i32
    scf.if %13 {
      %c0_11 = arith.constant 0 : index
      %c0_12 = arith.constant 0 : index
      %14 = vector.load %arg8[%c0_11, %c0_12] : memref<16x32xf32, #tpu.memory_space<vmem>>, vector<16x32xf32>
      %c0_13 = arith.constant 0 : index
      %c0_14 = arith.constant 0 : index
      %c0_15 = arith.constant 0 : index
      %15 = vector.load %arg6[%c0_13, %c0_14, %c0_15] : memref<1x1x32xf32, #tpu.memory_space<vmem>>, vector<1x1x32xf32>
      %16 = vector.shape_cast %15 : vector<1x1x32xf32> to vector<1x32xf32>
      %17 = vector.broadcast %16 : vector<1x32xf32> to vector<16x32xf32>
      %18 = arith.addf %14, %17 : vector<16x32xf32>
      %19 = arith.truncf %18 : vector<16x32xf32> to vector<16x32xbf16>
      %c0_16 = arith.constant 0 : index
      %c0_17 = arith.constant 0 : index
      %c0_18 = arith.constant 0 : index
      %20 = vector.load %arg7[%c0_16, %c0_17, %c0_18] : memref<1x16x32xbf16, #tpu.memory_space<vmem>>, vector<1x16x32xbf16>
      %21 = vector.shape_cast %20 : vector<1x16x32xbf16> to vector<16x32xbf16>
      %22 = vector.shape_cast %19 : vector<16x32xbf16> to vector<1x16x32xbf16>
      tpu.vector_store %arg7[%c0_16, %c0_17, %c0_18], %22 {strides = array<i32>} : memref<1x16x32xbf16, #tpu.memory_space<vmem>>, vector<1x16x32xbf16>,
    } else {
    }
    return
  }
  func.func @transform_0(%arg0: i32, %arg1: i32, %arg2: i32, %arg3: i32) -> (i32, i32) {
    %c0_i32 = arith.constant 0 : i32
    return %arg0, %arg3 : i32, i32
  }
  func.func @transform_1(%arg0: i32, %arg1: i32, %arg2: i32, %arg3: i32) -> (i32, i32, i32) {
    %c0_i32 = arith.constant 0 : i32
    return %arg1, %arg3, %arg2 : i32, i32, i32
  }
  func.func @transform_2(%arg0: i32, %arg1: i32, %arg2: i32, %arg3: i32) -> (i32, i32, i32) {
    %c0_i32 = arith.constant 0 : i32
    %c0_i32_0 = arith.constant 0 : i32
    return %arg1, %c0_i32, %arg2 : i32, i32, i32
  }
  func.func @transform_3(%arg0: i32, %arg1: i32, %arg2: i32, %arg3: i32) -> (i32, i32, i32) {
    %c0_i32 = arith.constant 0 : i32
    return %arg1, %arg0, %arg2 : i32, i32, i32
  }
}

module attributes {stable_mosaic.version = 11 : i64} {
  func.func @_flash_mha_kernel(%arg0: i32, %arg1: i32, %arg2: i32, %arg3: memref<1x1x8x4x8xbf16, #tpu.memory_space<vmem>>, %arg4: memref<1x1x8x4x8xbf16, #tpu.memory_space<vmem>>, %arg5: memref<1x1x8x4x8xbf16, #tpu.memory_space<vmem>>, %arg6: memref<1x8x32xbf16, #tpu.memory_space<vmem>>, %arg7: memref<4x8x8xbf16, #tpu.memory_space<vmem>>, %arg8: memref<4x8x1xf32, #tpu.memory_space<vmem>>, %arg9: memref<4x8x1xf32, #tpu.memory_space<vmem>>, %arg10: memref<4x8x8xf32, #tpu.memory_space<vmem>>) attributes {dimension_semantics = [#tpu.dimension_semantics<parallel>, #tpu.dimension_semantics<parallel>, #tpu.dimension_semantics<arbitrary>], iteration_bounds = array<i64: 2, 1, 1>, scalar_prefetch = 0 : i64, scratch_operands = 4 : i64, tpu.core_type = #tpu.core_type<tc>, window_params = [{transform_indices = @transform_0, window_bounds = array<i64: 1, 1, 8, 4, 8>}, {transform_indices = @transform_1, window_bounds = array<i64: 1, 1, 8, 4, 8>}, {transform_indices = @transform_2, window_bounds = array<i64: 1, 1, 8, 4, 8>}, {transform_indices = @transform_3, window_bounds = array<i64: 1, 8, 32>}]} {
    %c0_i32 = arith.constant 0 : i32
    %0 = arith.cmpi eq, %arg2, %c0_i32 : i32
    %1 = arith.extui %0 : i1 to i32
    %c0_i32_0 = arith.constant 0 : i32
    %2 = arith.cmpi ne, %1, %c0_i32_0 : i32
    scf.if %2 {
      %c0_39 = arith.constant 0 : index
      %c0_40 = arith.constant 0 : index
      %c0_41 = arith.constant 0 : index
      %c0_42 = arith.constant 0 : index
      %c0_43 = arith.constant 0 : index
      %38 = vector.load %arg3[%c0_39, %c0_40, %c0_41, %c0_42, %c0_43] : memref<1x1x8x4x8xbf16, #tpu.memory_space<vmem>>, vector<1x1x8x4x8xbf16>
      %39 = vector.shape_cast %38 : vector<1x1x8x4x8xbf16> to vector<8x4x8xbf16>
      %40 = tpu.transpose %39, [1, 0, 2] : vector<8x4x8xbf16> -> vector<4x8x8xbf16>
      %c0_44 = arith.constant 0 : index
      %c0_45 = arith.constant 0 : index
      %c0_46 = arith.constant 0 : index
      %41 = vector.load %arg7[%c0_44, %c0_45, %c0_46] : memref<4x8x8xbf16, #tpu.memory_space<vmem>>, vector<4x8x8xbf16>
      tpu.vector_store %arg7[%c0_44, %c0_45, %c0_46], %40 {strides = array<i32>} : memref<4x8x8xbf16, #tpu.memory_space<vmem>>, vector<4x8x8xbf16>,
      %cst_47 = arith.constant 0xFF800000 : f32
      %42 = vector.broadcast %cst_47 : f32 to vector<4x8x1xf32>
      %c0_48 = arith.constant 0 : index
      %c0_49 = arith.constant 0 : index
      %c0_50 = arith.constant 0 : index
      %43 = vector.load %arg8[%c0_48, %c0_49, %c0_50] : memref<4x8x1xf32, #tpu.memory_space<vmem>>, vector<4x8x1xf32>
      tpu.vector_store %arg8[%c0_48, %c0_49, %c0_50], %42 {strides = array<i32>} : memref<4x8x1xf32, #tpu.memory_space<vmem>>, vector<4x8x1xf32>,
      %cst_51 = arith.constant 0.000000e+00 : f32
      %44 = vector.broadcast %cst_51 : f32 to vector<4x8x1xf32>
      %c0_52 = arith.constant 0 : index
      %c0_53 = arith.constant 0 : index
      %c0_54 = arith.constant 0 : index
      %45 = vector.load %arg9[%c0_52, %c0_53, %c0_54] : memref<4x8x1xf32, #tpu.memory_space<vmem>>, vector<4x8x1xf32>
      tpu.vector_store %arg9[%c0_52, %c0_53, %c0_54], %44 {strides = array<i32>} : memref<4x8x1xf32, #tpu.memory_space<vmem>>, vector<4x8x1xf32>,
      %cst_55 = arith.constant 0.000000e+00 : f32
      %46 = vector.broadcast %cst_55 : f32 to vector<4x8x8xf32>
      %c0_56 = arith.constant 0 : index
      %c0_57 = arith.constant 0 : index
      %c0_58 = arith.constant 0 : index
      %47 = vector.load %arg10[%c0_56, %c0_57, %c0_58] : memref<4x8x8xf32, #tpu.memory_space<vmem>>, vector<4x8x8xf32>
      tpu.vector_store %arg10[%c0_56, %c0_57, %c0_58], %46 {strides = array<i32>} : memref<4x8x8xf32, #tpu.memory_space<vmem>>, vector<4x8x8xf32>,
    } else {
    }
    %c0 = arith.constant 0 : index
    %c0_1 = arith.constant 0 : index
    %c0_2 = arith.constant 0 : index
    %c0_3 = arith.constant 0 : index
    %c0_4 = arith.constant 0 : index
    %3 = vector.load %arg4[%c0, %c0_1, %c0_2, %c0_3, %c0_4] : memref<1x1x8x4x8xbf16, #tpu.memory_space<vmem>>, vector<1x1x8x4x8xbf16>
    %4 = vector.shape_cast %3 : vector<1x1x8x4x8xbf16> to vector<8x4x8xbf16>
    %5 = tpu.transpose %4, [1, 0, 2] : vector<8x4x8xbf16> -> vector<4x8x8xbf16>
    %c0_5 = arith.constant 0 : index
    %c0_6 = arith.constant 0 : index
    %c0_7 = arith.constant 0 : index
    %c0_8 = arith.constant 0 : index
    %c0_9 = arith.constant 0 : index
    %6 = vector.load %arg5[%c0_5, %c0_6, %c0_7, %c0_8, %c0_9] : memref<1x1x8x4x8xbf16, #tpu.memory_space<vmem>>, vector<1x1x8x4x8xbf16>
    %7 = vector.shape_cast %6 : vector<1x1x8x4x8xbf16> to vector<8x4x8xbf16>
    %8 = tpu.transpose %7, [1, 0, 2] : vector<8x4x8xbf16> -> vector<4x8x8xbf16>
    %c0_10 = arith.constant 0 : index
    %c0_11 = arith.constant 0 : index
    %c0_12 = arith.constant 0 : index
    %9 = vector.load %arg7[%c0_10, %c0_11, %c0_12] : memref<4x8x8xbf16, #tpu.memory_space<vmem>>, vector<4x8x8xbf16>
    "tpu.trace_start"() <{level = 10 : i32, message = "hqd,hkd->hqk"}> : () -> ()
    %cst = arith.constant dense<0.000000e+00> : vector<4x8x8xf32>
    %10 = tpu.matmul %9, %5, %cst {dimension_numbers = #tpu.dot_dimension_numbers<[2], [2], [1], [1], [0, 0, 0, 1, 1, 1], [0], [0]>} : vector<4x8x8xbf16>, vector<4x8x8xbf16>, vector<4x8x8xf32> -> vector<4x8x8xf32>
    "tpu.trace_stop"() : () -> ()
    %c0_13 = arith.constant 0 : index
    %c0_14 = arith.constant 0 : index
    %c0_15 = arith.constant 0 : index
    %11 = vector.load %arg8[%c0_13, %c0_14, %c0_15] : memref<4x8x1xf32, #tpu.memory_space<vmem>>, vector<4x8x1xf32>
    %cst_16 = arith.constant dense<0xFF800000> : vector<4x8xf32>
    %12 = vector.multi_reduction <maximumf>, %10, %cst_16 [2] : vector<4x8x8xf32> to vector<4x8xf32>
    %13 = vector.shape_cast %12 : vector<4x8xf32> to vector<4x8x1xf32>
    %14 = arith.maximumf %11, %13 : vector<4x8x1xf32>
    %c0_17 = arith.constant 0 : index
    %c0_18 = arith.constant 0 : index
    %c0_19 = arith.constant 0 : index
    %15 = vector.load %arg8[%c0_17, %c0_18, %c0_19] : memref<4x8x1xf32, #tpu.memory_space<vmem>>, vector<4x8x1xf32>
    %16 = arith.subf %15, %14 : vector<4x8x1xf32>
    %17 = math.exp %16 : vector<4x8x1xf32>
    %18 = vector.broadcast %14 : vector<4x8x1xf32> to vector<4x8x8xf32>
    %19 = arith.subf %10, %18 : vector<4x8x8xf32>
    %20 = math.exp %19 : vector<4x8x8xf32>
    %c0_20 = arith.constant 0 : index
    %c0_21 = arith.constant 0 : index
    %c0_22 = arith.constant 0 : index
    %21 = vector.load %arg9[%c0_20, %c0_21, %c0_22] : memref<4x8x1xf32, #tpu.memory_space<vmem>>, vector<4x8x1xf32>
    %22 = arith.mulf %17, %21 : vector<4x8x1xf32>
    %cst_23 = arith.constant dense<0.000000e+00> : vector<4x8xf32>
    %23 = vector.multi_reduction <add>, %20, %cst_23 [2] : vector<4x8x8xf32> to vector<4x8xf32>
    %24 = vector.shape_cast %23 : vector<4x8xf32> to vector<4x8x1xf32>
    %25 = arith.addf %22, %24 : vector<4x8x1xf32>
    %c0_24 = arith.constant 0 : index
    %c0_25 = arith.constant 0 : index
    %c0_26 = arith.constant 0 : index
    %26 = vector.load %arg9[%c0_24, %c0_25, %c0_26] : memref<4x8x1xf32, #tpu.memory_space<vmem>>, vector<4x8x1xf32>
    tpu.vector_store %arg9[%c0_24, %c0_25, %c0_26], %25 {strides = array<i32>} : memref<4x8x1xf32, #tpu.memory_space<vmem>>, vector<4x8x1xf32>,
    %c0_27 = arith.constant 0 : index
    %c0_28 = arith.constant 0 : index
    %c0_29 = arith.constant 0 : index
    %27 = vector.load %arg10[%c0_27, %c0_28, %c0_29] : memref<4x8x8xf32, #tpu.memory_space<vmem>>, vector<4x8x8xf32>
    %28 = vector.broadcast %17 : vector<4x8x1xf32> to vector<4x8x8xf32>
    %29 = arith.mulf %28, %27 : vector<4x8x8xf32>
    %30 = arith.truncf %20 : vector<4x8x8xf32> to vector<4x8x8xbf16>
    "tpu.trace_start"() <{level = 10 : i32, message = "hqk,hkd->hqd"}> : () -> ()
    %cst_30 = arith.constant dense<0.000000e+00> : vector<4x8x8xf32>
    %31 = tpu.matmul %30, %8, %cst_30 {dimension_numbers = #tpu.dot_dimension_numbers<[2], [1], [1], [2], [0, 0, 0, 1, 1, 2], [0], [0]>} : vector<4x8x8xbf16>, vector<4x8x8xbf16>, vector<4x8x8xf32> -> vector<4x8x8xf32>
    "tpu.trace_stop"() : () -> ()
    %32 = arith.addf %29, %31 : vector<4x8x8xf32>
    %c0_31 = arith.constant 0 : index
    %c0_32 = arith.constant 0 : index
    %c0_33 = arith.constant 0 : index
    %33 = vector.load %arg10[%c0_31, %c0_32, %c0_33] : memref<4x8x8xf32, #tpu.memory_space<vmem>>, vector<4x8x8xf32>
    tpu.vector_store %arg10[%c0_31, %c0_32, %c0_33], %32 {strides = array<i32>} : memref<4x8x8xf32, #tpu.memory_space<vmem>>, vector<4x8x8xf32>,
    %c0_34 = arith.constant 0 : index
    %c0_35 = arith.constant 0 : index
    %c0_36 = arith.constant 0 : index
    %34 = vector.load %arg8[%c0_34, %c0_35, %c0_36] : memref<4x8x1xf32, #tpu.memory_space<vmem>>, vector<4x8x1xf32>
    tpu.vector_store %arg8[%c0_34, %c0_35, %c0_36], %14 {strides = array<i32>} : memref<4x8x1xf32, #tpu.memory_space<vmem>>, vector<4x8x1xf32>,
    %c0_i32_37 = arith.constant 0 : i32
    %35 = arith.cmpi eq, %arg2, %c0_i32_37 : i32
    %36 = arith.extui %35 : i1 to i32
    %c0_i32_38 = arith.constant 0 : i32
    %37 = arith.cmpi ne, %36, %c0_i32_38 : i32
    scf.if %37 {
      %c0_39 = arith.constant 0 : index
      %c0_40 = arith.constant 0 : index
      %c0_41 = arith.constant 0 : index
      %38 = vector.load %arg10[%c0_39, %c0_40, %c0_41] : memref<4x8x8xf32, #tpu.memory_space<vmem>>, vector<4x8x8xf32>
      %c0_42 = arith.constant 0 : index
      %c0_43 = arith.constant 0 : index
      %c0_44 = arith.constant 0 : index
      %39 = vector.load %arg9[%c0_42, %c0_43, %c0_44] : memref<4x8x1xf32, #tpu.memory_space<vmem>>, vector<4x8x1xf32>
      %40 = tpu.reciprocal %39 {approx = true} : vector<4x8x1xf32> -> vector<4x8x1xf32>
      %41 = vector.broadcast %40 : vector<4x8x1xf32> to vector<4x8x8xf32>
      %42 = arith.mulf %38, %41 : vector<4x8x8xf32>
      %43 = tpu.transpose %42, [1, 0, 2] : vector<4x8x8xf32> -> vector<8x4x8xf32>
      %44 = vector.shape_cast %43 : vector<8x4x8xf32> to vector<8x32xf32>
      %45 = arith.truncf %44 : vector<8x32xf32> to vector<8x32xbf16>
      %c0_45 = arith.constant 0 : index
      %c0_46 = arith.constant 0 : index
      %c0_47 = arith.constant 0 : index
      %46 = vector.load %arg6[%c0_45, %c0_46, %c0_47] : memref<1x8x32xbf16, #tpu.memory_space<vmem>>, vector<1x8x32xbf16>
      %47 = vector.shape_cast %46 : vector<1x8x32xbf16> to vector<8x32xbf16>
      %48 = vector.shape_cast %45 : vector<8x32xbf16> to vector<1x8x32xbf16>
      tpu.vector_store %arg6[%c0_45, %c0_46, %c0_47], %48 {strides = array<i32>} : memref<1x8x32xbf16, #tpu.memory_space<vmem>>, vector<1x8x32xbf16>,
    } else {
    }
    return
  }
  func.func @transform_0(%arg0: i32, %arg1: i32, %arg2: i32) -> (i32, i32, i32, i32, i32) {
    %c0_i32 = arith.constant 0 : i32
    %c0_i32_0 = arith.constant 0 : i32
    %c0_i32_1 = arith.constant 0 : i32
    %c0_i32_2 = arith.constant 0 : i32
    return %c0_i32, %arg0, %arg1, %c0_i32_0, %c0_i32_1 : i32, i32, i32, i32, i32
  }
  func.func @transform_1(%arg0: i32, %arg1: i32, %arg2: i32) -> (i32, i32, i32, i32, i32) {
    %c1_i32 = arith.constant 1 : i32
    %c0_i32 = arith.constant 0 : i32
    %c0_i32_0 = arith.constant 0 : i32
    %c0_i32_1 = arith.constant 0 : i32
    return %c1_i32, %arg0, %arg2, %c0_i32, %c0_i32_0 : i32, i32, i32, i32, i32
  }
  func.func @transform_2(%arg0: i32, %arg1: i32, %arg2: i32) -> (i32, i32, i32, i32, i32) {
    %c2_i32 = arith.constant 2 : i32
    %c0_i32 = arith.constant 0 : i32
    %c0_i32_0 = arith.constant 0 : i32
    %c0_i32_1 = arith.constant 0 : i32
    return %c2_i32, %arg0, %arg2, %c0_i32, %c0_i32_0 : i32, i32, i32, i32, i32
  }
  func.func @transform_3(%arg0: i32, %arg1: i32, %arg2: i32) -> (i32, i32, i32) {
    %c0_i32 = arith.constant 0 : i32
    %c0_i32_0 = arith.constant 0 : i32
    return %arg0, %arg1, %c0_i32 : i32, i32, i32
  }
}

module attributes {stable_mosaic.version = 11 : i64} {
  func.func @_linear_kernel(%arg0: i32, %arg1: i32, %arg2: i32, %arg3: memref<16x32xbf16, #tpu.memory_space<vmem>>, %arg4: memref<32x32xbf16, #tpu.memory_space<vmem>>, %arg5: memref<1x32xf32, #tpu.memory_space<vmem>>, %arg6: memref<16x32xf32, #tpu.memory_space<vmem>>, %arg7: memref<16x32xf32, #tpu.memory_space<vmem>>) attributes {dimension_semantics = [#tpu.dimension_semantics<parallel>, #tpu.dimension_semantics<parallel>, #tpu.dimension_semantics<arbitrary>], iteration_bounds = array<i64: 1, 1, 1>, scalar_prefetch = 0 : i64, scratch_operands = 1 : i64, tpu.core_type = #tpu.core_type<tc>, window_params = [{transform_indices = @transform_0, window_bounds = array<i64: 16, 32>}, {transform_indices = @transform_1, window_bounds = array<i64: 32, 32>}, {transform_indices = @transform_2, window_bounds = array<i64: 1, 32>}, {transform_indices = @transform_3, window_bounds = array<i64: 16, 32>}]} {
    %c0_i32 = arith.constant 0 : i32
    %0 = arith.cmpi eq, %arg2, %c0_i32 : i32
    %1 = arith.extui %0 : i1 to i32
    %c0_i32_0 = arith.constant 0 : i32
    %2 = arith.cmpi ne, %1, %c0_i32_0 : i32
    scf.if %2 {
      %cst_10 = arith.constant 0.000000e+00 : f32
      %12 = vector.broadcast %cst_10 : f32 to vector<16x32xf32>
      %c0_11 = arith.constant 0 : index
      %c0_12 = arith.constant 0 : index
      %13 = vector.load %arg7[%c0_11, %c0_12] : memref<16x32xf32, #tpu.memory_space<vmem>>, vector<16x32xf32>
      tpu.vector_store %arg7[%c0_11, %c0_12], %12 {strides = array<i32>} : memref<16x32xf32, #tpu.memory_space<vmem>>, vector<16x32xf32>,
    } else {
    }
    %c0 = arith.constant 0 : index
    %c0_1 = arith.constant 0 : index
    %3 = vector.load %arg7[%c0, %c0_1] : memref<16x32xf32, #tpu.memory_space<vmem>>, vector<16x32xf32>
    %c0_2 = arith.constant 0 : index
    %c0_3 = arith.constant 0 : index
    %4 = vector.load %arg3[%c0_2, %c0_3] : memref<16x32xbf16, #tpu.memory_space<vmem>>, vector<16x32xbf16>
    %c0_4 = arith.constant 0 : index
    %c0_5 = arith.constant 0 : index
    %5 = vector.load %arg4[%c0_4, %c0_5] : memref<32x32xbf16, #tpu.memory_space<vmem>>, vector<32x32xbf16>
    %cst = arith.constant dense<0.000000e+00> : vector<16x32xf32>
    %6 = tpu.matmul %4, %5, %cst {dimension_numbers = #tpu.dot_dimension_numbers<[1], [0], [0], [1], [0, 0, 1, 1], [], []>} : vector<16x32xbf16>, vector<32x32xbf16>, vector<16x32xf32> -> vector<16x32xf32>
    %7 = arith.addf %3, %6 : vector<16x32xf32>
    %c0_6 = arith.constant 0 : index
    %c0_7 = arith.constant 0 : index
    %8 = vector.load %arg7[%c0_6, %c0_7] : memref<16x32xf32, #tpu.memory_space<vmem>>, vector<16x32xf32>
    tpu.vector_store %arg7[%c0_6, %c0_7], %7 {strides = array<i32>} : memref<16x32xf32, #tpu.memory_space<vmem>>, vector<16x32xf32>,
    %c0_i32_8 = arith.constant 0 : i32
    %9 = arith.cmpi eq, %arg2, %c0_i32_8 : i32
    %10 = arith.extui %9 : i1 to i32
    %c0_i32_9 = arith.constant 0 : i32
    %11 = arith.cmpi ne, %10, %c0_i32_9 : i32
    scf.if %11 {
      %c0_10 = arith.constant 0 : index
      %c0_11 = arith.constant 0 : index
      %12 = vector.load %arg7[%c0_10, %c0_11] : memref<16x32xf32, #tpu.memory_space<vmem>>, vector<16x32xf32>
      %c0_12 = arith.constant 0 : index
      %c0_13 = arith.constant 0 : index
      %13 = vector.load %arg5[%c0_12, %c0_13] : memref<1x32xf32, #tpu.memory_space<vmem>>, vector<1x32xf32>
      %14 = vector.broadcast %13 : vector<1x32xf32> to vector<16x32xf32>
      %15 = arith.addf %12, %14 : vector<16x32xf32>
      %c0_14 = arith.constant 0 : index
      %c0_15 = arith.constant 0 : index
      %16 = vector.load %arg6[%c0_14, %c0_15] : memref<16x32xf32, #tpu.memory_space<vmem>>, vector<16x32xf32>
      tpu.vector_store %arg6[%c0_14, %c0_15], %15 {strides = array<i32>} : memref<16x32xf32, #tpu.memory_space<vmem>>, vector<16x32xf32>,
    } else {
    }
    return
  }
  func.func @transform_0(%arg0: i32, %arg1: i32, %arg2: i32) -> (i32, i32) {
    %c0_i32 = arith.constant 0 : i32
    return %arg0, %arg2 : i32, i32
  }
  func.func @transform_1(%arg0: i32, %arg1: i32, %arg2: i32) -> (i32, i32) {
    %c0_i32 = arith.constant 0 : i32
    return %arg2, %arg1 : i32, i32
  }
  func.func @transform_2(%arg0: i32, %arg1: i32, %arg2: i32) -> (i32, i32) {
    %c0_i32 = arith.constant 0 : i32
    %c0_i32_0 = arith.constant 0 : i32
    return %c0_i32, %arg1 : i32, i32
  }
  func.func @transform_3(%arg0: i32, %arg1: i32, %arg2: i32) -> (i32, i32) {
    %c0_i32 = arith.constant 0 : i32
    return %arg0, %arg1 : i32, i32
  }
}

</mosaic_0001>

<bundles_post_ra>
// kernel: multi_head_attention.3
= control target key start
LH: loop header
LB: loop body
LE: loop exit
PB: predicated region body
PF: predicated region fallthrough
CT: control target
= control target key end

     0   :  { %s647_s12 = smov 0   ;;  %s649_s13 = smov 0   ;;  %s694_s0 = inlined_call_operand.vmem [shape: f32[16,32], index: 0, kind: input, shape index: {}]   ;;  %s695_s1 = inlined_call_operand.vmem [shape: bf16[3,32,32], index: 1, kind: input, shape index: {}]   ;;  %s696_s2 = inlined_call_operand.vmem [shape: f32[3,1,32], index: 2, kind: input, shape index: {}]   ;;  %s697_s3 = inlined_call_operand.vmem [shape: bf16[3,16,32], index: 3, kind: output, shape index: {}]  }
   0x1   :  { %s651_s14 = smov 0  }
   0x2 LB: > { %s35_s15 = sadd.s32 1, %s619_s13  ;;  %p545_p0 = scmp.ge.s32.totalorder %s623_s14, 1  ;;  %s623_s14 = sphi %s651_s14, %s13_s14   ;;  %s619_s13 = sphi %s649_s13, %s699_s13   ;;  %s615_s12 = sphi %s647_s12, %s698_s12  }
   0x3   : > { %p37_p1 = scmp.ge.s32.totalorder %s35_s15, 3  ;;  %p208_p2 = scmp.lt.s32.totalorder %s623_s14, 4 }
   0x5   : > { %s701_s15 = smov (%p37_p1, %s35_s15), 0  ;;  %p209_p3 = pnand %p545_p0, %p208_p2 }
   0x6   : > { %p270_p4 = scmp.lt.s32.totalorder (!%p209_p3), %s615_s12, 2 }
   0x7   : > { %212 = sbr.rel (%p209_p3) target bundleno = 235 (0xeb), region = 32 }
   0xc   : > { %vm306_vm0 = vcmask 261120   ;;  %v625_v0 = vmov 0.0   ;;  %vm626_vm1 = vmmov 0   ;;  %s703_s12 = smov (!%p270_p4, %s615_s12), 2  ;;  %v311_v3 = vld [vmem:[%s694_s0] sm:$0xff]  ;;  %v312_v4 = vld [vmem:[%s694_s0 + $0x8] sm:$0xff] }
   0xd   : > { %565 = vmatprep.subr.bf16.mxu0 %v625_v0  ;;  %569 = vmatprep.mubr.msk.bf16.mxu0 %vm626_vm1, %v625_v0  ;;  %307 = vst.msk [vmem:[#allocation2] sm:$0xff] %vm306_vm0, %v625_v0  ;;  %308 = vst.msk [vmem:[#allocation2 + $0x8] sm:$0xff] %vm306_vm0, %v625_v0  ;;  %s558_s16 = sshll.u32 %s703_s12, 4  ;;  %v313_v5 = vpack.c.bf16 %v312_v4, %v311_v3  ;;  %s287_s26 = scalar_lea.vmem %s696_s2, %s703_s12  ;;  %vm401_vm2 = vcmask 257024  }
   0xe   : > { %s280_s19 = scalar_lea.vmem %s695_s1, %s558_s16  ;;  %v553_v14 = vld [vmem:[%s287_s26] ss:$0 sm:$0xff]  ;;  %s559_s27 = sshll.u32 %s703_s12, 3 }
   0xf   : > { %v599_v1 = vld [vmem:[%s280_s19 + $0x8] sm:$0xff]   ;;  %v600_v2 = vld [vmem:[%s280_s19] sm:$0xff]   ;;  %s299_s30 = scalar_lea.vmem %s697_s3, %s559_s27 }
  0x10   : > { %566 = vmatpush3.bf16.msra.mxu0 %v599_v1 }
  0x11   : > { %567 = vmatprep.subr.bf16.mxu0 %v625_v0 }
  0x14   : > { %568 = vmatpush3.bf16.msra.mxu0 %v600_v2  ;;  %v309_v6 = vld [vmem:[#allocation2] sm:$0xff]  ;;  %v310_v10 = vld [vmem:[#allocation2 + $0x8] sm:$0xff] }
  0x17   : > { %570 = vmatmul.mubr.msk.bf16.vlgmr.msra.gmra.mxu0 %vm306_vm0, %v313_v5 }
  0xd7   : > { %v368_v7 = vpop.f32.mrf.mxu0 }
  0xd8   : > { %v375_v8 = vadd.f32 %v368_v7, %v309_v6 }
  0xd9   : > { %v571_v9 = vpop.f32.mrf.mxu0 }
  0xda   : > { %377 = vst.msk [vmem:[#allocation2] sm:$0xff] %vm306_vm0, %v375_v8 }
  0xdb   : > { %v371_v11 = vpop.f32.mrf.mxu0 }
  0xdc   : > { %v376_v12 = vadd.f32 %v371_v11, %v310_v10 }
  0xdd   : > { %v572_v13 = vpop.f32.mrf.mxu0 }
  0xde   : > { %378 = vst.msk [vmem:[#allocation2 + $0x8] sm:$0xff] %vm306_vm0, %v376_v12 }
  0xe1   : > { %v382_v15 = vld [vmem:[#allocation2] sm:$0xff] }
  0xe2   : > { %v391_v16 = vadd.f32 %v553_v14, %v382_v15 }
  0xe4   : > { %v560_v17 = vpack.c.bf16 %v391_v16, %v391_v16 }
  0xe5   : > { %v383_v18 = vld [vmem:[#allocation2 + $0x8] sm:$0xff] }
  0xe6   : > { %402 = vst.msk [vmem:[%s299_s30] sm:$0xf] %vm401_vm2, %v560_v17  ;;  %v392_v19 = vadd.f32 %v553_v14, %v383_v18 }
  0xe8   : > { %v561_v20 = vpack.c.bf16 %v392_v19, %v392_v19 }
  0xea   : > { %403 = vst.msk [vmem:[%s299_s30 + $0x4] sm:$0xf] %vm401_vm2, %v561_v20 }
  0xeb PF: > { %s13_s14 = sadd.s32 1, %s623_s14   ;;  %s698_s12 = smov %s619_s13 }
  0xec   : > { %p10_p5 = scmp.ge.s32.totalorder %s13_s14, 5   ;;  %s699_s13 = smov %s701_s15 }
  0xee   :  { %12 = sbr.rel (!%p10_p5) target bundleno = 2 (0x2), region = 76 }

// kernel: multi_head_attention.5
= control target key start
LH: loop header
LB: loop body
LE: loop exit
PB: predicated region body
PF: predicated region fallthrough
CT: control target
= control target key end

     0   :  { %v175_v1 = vmov 0.0   ;;  %vm176_vm0 = vmmov 0   ;;  %vm20_vm1 = vcmask 261120   ;;  %s222_s0 = inlined_call_operand.vmem [shape: bf16[16,32], index: 0, kind: input, shape index: {}]   ;;  %s223_s1 = inlined_call_operand.vmem [shape: bf16[32,32], index: 1, kind: input, shape index: {}]   ;;  %s224_s2 = inlined_call_operand.vmem [shape: f32[1,32], index: 2, kind: input, shape index: {}]   ;;  %s225_s3 = inlined_call_operand.hbm [shape: f32[16,32], index: 3, kind: output, shape index: {}]  }
   0x1   :  { %v150_v0 = vld [vmem:[%s223_s1 + $0x8] sm:$0xff]   ;;  %137 = vmatprep.subr.bf16.mxu0 %v175_v1  ;;  %v151_v2 = vld [vmem:[%s223_s1] sm:$0xff]   ;;  %141 = vmatprep.mubr.msk.bf16.mxu0 %vm176_vm0, %v175_v1  ;;  %21 = vst.msk [vmem:[#allocation2] sm:$0xff] %vm20_vm1, %v175_v1  ;;  %22 = vst.msk [vmem:[#allocation2 + $0x8] sm:$0xff] %vm20_vm1, %v175_v1 }
   0x2   :  { %138 = vmatpush3.bf16.msra.mxu0 %v150_v0 }
   0x3   :  { %139 = vmatprep.subr.bf16.mxu0 %v175_v1 }
   0x4   :  { %8 = vsyncpa [#allocation4], 0  ;;  %v152_v3 = vld [vmem:[%s222_s0] sm:$0xff]   ;;  %s177_s0 = smov [#allocation3]  }
   0x5   :  { %v133_v12 = vld [vmem:[%s224_s2] ss:$0 sm:$0xff]  ;;  %s118_s19 = sshll.u32 %s177_s0, 4  ;;  %s119_s19 = int_to_ptr.vmem [resolvable:$true] %s118_s19 }
   0x6   :  { %140 = vmatpush3.bf16.msra.mxu0 %v151_v2  ;;  %s153_s20 = scalar_lea.vmem %s119_s19, 256  ;;  %p158_p1 = scmp.lt.s32.totalorder %s119_s19, %s119_s19 }
   0x7   :  { %p154_p0 = scmp.ne.s32.totalorder %s119_s19, %s153_s20  ;;  %p159_p2 = scmp.lt.s32.totalorder %s153_s20, %s153_s20 }
   0x8   :  { %v23_v4 = vld [vmem:[#allocation2] sm:$0xff]  ;;  %v24_v8 = vld [vmem:[#allocation2 + $0x8] sm:$0xff] }
   0x9   :  { %142 = vmatmul.mubr.msk.bf16.vlgmr.msra.gmra.mxu0 %vm20_vm1, %v152_v3  ;;  %p160_p3 = por %p159_p2, %p158_p1 }
   0xb   :  { %p161_p4 = pnand %p160_p3, %p154_p0 }
  0xc9   :  { %v86_v5 = vpop.f32.mrf.mxu0 }
  0xca   :  { %v93_v6 = vadd.f32 %v86_v5, %v23_v4 }
  0xcb   :  { %v143_v7 = vpop.f32.mrf.mxu0 }
  0xcc   :  { %95 = vst.msk [vmem:[#allocation2] sm:$0xff] %vm20_vm1, %v93_v6 }
  0xcd   :  { %v89_v9 = vpop.f32.mrf.mxu0 }
  0xce   :  { %v94_v10 = vadd.f32 %v89_v9, %v24_v8 }
  0xcf   :  { %v144_v11 = vpop.f32.mrf.mxu0 }
  0xd0   :  { %96 = vst.msk [vmem:[#allocation2 + $0x8] sm:$0xff] %vm20_vm1, %v94_v10 }
  0xd3   :  { %v100_v13 = vld [vmem:[#allocation2] sm:$0xff] }
  0xd4   :  { %v109_v14 = vadd.f32 %v133_v12, %v100_v13 }
  0xd6   :  { %111 = vst.msk [vmem:[#allocation3] sm:$0xff] %vm20_vm1, %v109_v14 }
  0xd7   :  { %v101_v15 = vld [vmem:[#allocation2 + $0x8] sm:$0xff] }
  0xd8   :  { %v110_v16 = vadd.f32 %v133_v12, %v101_v15 }
  0xda   :  { %112 = vst.msk [vmem:[#allocation3 + $0x8] sm:$0xff] %vm20_vm1, %v110_v16 }
  0xdb   :  { %164 = shalt.err (!%p161_p4)
}
  0xdc   :  { %s178_s21 = smov 128   ;;  %s179_s2 = smov 8  }
  0xdd   :  { %124 = dma.vmem_to_hbm [thread:$0]  %s119_s19, 256, %s225_s3, [#allocation4], %s178_s21, %s178_s21, %s179_s2  }
  0xde   :  { %173 = dma.done.wait [#allocation4], 256  }
  0xdf   :  { %174 = vsyncadd [#allocation4], 4294967040 }
  0xe0   :  { %128 = vsyncpa [#allocation4], 1 }

// kernel: multi_head_attention.4
= control target key start
LH: loop header
LB: loop body
LE: loop exit
PB: predicated region body
PF: predicated region fallthrough
CT: control target
= control target key end

     0   :  { %s1689_s12 = smov 0   ;;  %s1691_s13 = smov 0   ;;  %s1932_s0 = inlined_call_operand.vmem [shape: bf16[3,2,8,4,8], index: 0, kind: input, shape index: {}, may-alias: {0,1,2}]   ;;  %s1933_s1 = inlined_call_operand.vmem [shape: bf16[3,2,8,4,8], index: 1, kind: input, shape index: {}, may-alias: {0,1,2}]   ;;  %s1934_s2 = inlined_call_operand.vmem [shape: bf16[3,2,8,4,8], index: 2, kind: input, shape index: {}, may-alias: {0,1,2}]   ;;  %s1935_s3 = inlined_call_operand.vmem [shape: bf16[2,8,32], index: 3, kind: output, shape index: {}]  }
   0x1   :  { %s1693_s14 = smov 0  }
   0x2 LB: > { %s32_s15 = sadd.s32 1, %s1654_s13  ;;  %p1450_p0 = scmp.ge.s32.totalorder %s1658_s14, 1  ;;  %s1658_s14 = sphi %s1693_s14, %s13_s14   ;;  %s1654_s13 = sphi %s1691_s13, %s1937_s13   ;;  %s1650_s12 = sphi %s1689_s12, %s1936_s12  }
   0x3   : > { %p34_p1 = scmp.ge.s32.totalorder %s32_s15, 2  ;;  %p201_p2 = scmp.lt.s32.totalorder %s1658_s14, 3 }
   0x5   : > { %s1939_s15 = smov (%p34_p1, %s32_s15), 0  ;;  %p202_p3 = pnand %p1450_p0, %p201_p2 }
   0x6   : > { %p252_p4 = scmp.lt.s32.totalorder (!%p202_p3), %s1650_s12, 1  ;;  %s1666_s26 = smov (!%p202_p3), 16  }
   0x7   : > { %205 = sbr.rel (%p202_p3) target bundleno = 955 (0x3bb), region = 32  ;;  %s1667_s27 = smov (!%p202_p3), 8  }
   0x8   : > { %s1668_s28 = smov (!%p202_p3), 24  }
   0xc   : > { %v307_v0 = vlaneseq  ;;  %v1660_v1 = vmov 0.0   ;;  %v1661_v2 = vmov 1934713408   ;;  %vm413_vm0 = vcmask 64512   ;;  %s1941_s12 = smov (!%p252_p4, %s1650_s12), 1 }
   0xd   : > { %1505 = vmatprep.subr.bf16.mxu0 %v1660_v1  ;;  %v305_v3 = vunpack.c.l.s4 %v1661_v2  ;;  %1511 = vmatprep.subr.bf16.mxu1 %v1660_v1  ;;  %414 = vst.msk [vmem:[#allocation5] sm:$0xff] %vm413_vm0, %v1660_v1  ;;  %415 = vst.msk [vmem:[#allocation5 + $0x8] sm:$0xff] %vm413_vm0, %v1660_v1  ;;  %vm1662_vm1 = vmmov 0   ;;  %v1663_v6 = vmov 0   ;;  %s1726_s16 = sshll.u32 %s1941_s12, 4  ;;  %vm399_vm2 = vcmask 60416  }
   0xe   : > { %v308_v4 = vshrl.u32 %v307_v0, 7  ;;  %416 = vst.msk [vmem:[#allocation5 + $0x10] sm:$0xff] %vm413_vm0, %v1660_v1  ;;  %417 = vst.msk [vmem:[#allocation5 + $0x18] sm:$0xff] %vm413_vm0, %v1660_v1  ;;  %1507 = vmatprep.mubr.msk.bf16.mxu0 %vm1662_vm1, %v1660_v1  ;;  %1513 = vmatprep.mubr.msk.bf16.mxu1 %vm1662_vm1, %v1660_v1  ;;  %v1664_v7 = vmov 1983009808   ;;  %s1387_s19 = scalar_lea.vmem %s1933_s1, %s1726_s16  ;;  %s259_s22 = scalar_lea.vmem %s1932_s0, %s1726_s16  ;;  %vm404_vm3 = vcmask 7168  }
   0xf   : > { %v306_v5 = vunpack.c.0.s8 %v305_v3  ;;  %1586 = vset.pattern.permute.xlu0 %v1663_v6  ;;  %1587 = vset.pattern.permute.xlu1 %v1663_v6  ;;  %v365_v8 = vunpack.c.l.s4 %v1664_v7  ;;  %v1624_v11 = vld.sshfl [vmem:[%s1387_s19 + $0x20] sm:$0x33 pattern:$0x73516240]  ;;  %409 = vst.msk [vmem:[#allocation4] sm:$0xff] %vm404_vm3, %v1660_v1  ;;  %410 = vst.msk [vmem:[#allocation4 + $0x8] sm:$0xff] %vm404_vm3, %v1660_v1  ;;  %s1392_s25 = scalar_lea.vmem %s1934_s2, %s1726_s16 }
  0x10   : > { %v1625_v12 = vld.sshfl [vmem:[%s1387_s19 + $0x22] sm:$0x33 pattern:$0x73516240]  ;;  %v465_v16 = vshrl.u32 %v1624_v11, 16  ;;  %v434_v17 = vcombine.high %v1624_v11, %v1663_v6  ;;  %411 = vst.msk [vmem:[#allocation4 + $0x10] sm:$0xff] %vm404_vm3, %v1660_v1 }
  0x11   : > { %v1732_v9 = vsub.s32 %v306_v5, %v308_v4  ;;  %v366_v10 = vunpack.c.0.s8 %v365_v8  ;;  %v1626_v13 = vld.sshfl [vmem:[%s1387_s19 + $0x28] sm:$0x33 pattern:$0x73516240]  ;;  %v464_v18 = vpack.i.b16 %v1625_v12, %v1624_v11  ;;  %v466_v20 = vshrl.u32 %v1625_v12, 16  ;;  %412 = vst.msk [vmem:[#allocation4 + $0x18] sm:$0xff] %vm404_vm3, %v1660_v1 }
  0x12   : > { %v1627_v14 = vld.sshfl [vmem:[%s1387_s19 + $0x2a] sm:$0x33 pattern:$0x73516240]  ;;  %v477_v21 = vshrl.u32 %v1626_v13, 16  ;;  %v443_v27 = vcombine.high %v1625_v12, %v1663_v6  ;;  %v452_v28 = vcombine.high %v1626_v13, %v1663_v6  ;;  %v471_v44 = vshrl.u32 %v434_v17, 16 }
  0x13   : > { %v1738_v15 = vsub.s32 %v366_v10, %v308_v4  ;;  %v476_v19 = vpack.i.b16 %v1627_v14, %v1626_v13  ;;  %v1628_v22 = vld.sshfl [vmem:[%s259_s22] sm:$0x33 pattern:$0x73516240]  ;;  %v478_v24 = vshrl.u32 %v1627_v14, 16  ;;  %v461_v29 = vcombine.high %v1627_v14, %v1663_v6  ;;  %s1457_s29 = sshll.u32 %s1941_s12, 2 }
  0x14   : > { %v1629_v23 = vld.sshfl [vmem:[%s259_s22 + $0x2] sm:$0x33 pattern:$0x73516240]  ;;  %v467_v31 = vpack.i.b16 %v466_v20, %v465_v16  ;;  %v470_v33 = vpack.i.b16 %v443_v27, %v434_v17  ;;  %v342_v37 = vshrl.u32 %v1628_v22, 16  ;;  %v472_v48 = vshrl.u32 %v443_v27, 16  ;;  %s289_s5 = scalar_lea.vmem %s1935_s3, %s1457_s29 }
  0x15   : > { %v1630_v25 = vld.sshfl [vmem:[%s259_s22 + $0x8] sm:$0x33 pattern:$0x73516240]  ;;  %v558_v30 = vcombine.low %v464_v18, %v476_v19  ;;  %v479_v32 = vpack.i.b16 %v478_v24, %v477_v21  ;;  %v341_v35 = vpack.i.b16 %v1629_v23, %v1628_v22  ;;  %v482_v36 = vpack.i.b16 %v461_v29, %v452_v28 }
  0x16   : > { %v1631_v26 = vld.sshfl [vmem:[%s259_s22 + $0xa] sm:$0x33 pattern:$0x73516240]  ;;  %v343_v40 = vshrl.u32 %v1629_v23, 16  ;;  %v354_v41 = vshrl.u32 %v1630_v25, 16  ;;  %v473_v55 = vpack.i.b16 %v472_v48, %v471_v44  ;;  %v311_v56 = vcombine.high %v1628_v22, %v1663_v6 }
  0x17   : > { %v565_v34 = vrot.slane %v558_v30, %v1738_v15  ;;  %v613_v38 = vcombine.low %v467_v31, %v479_v32  ;;  %v353_v39 = vpack.i.b16 %v1631_v26, %v1630_v25  ;;  %v355_v43 = vshrl.u32 %v1631_v26, 16 }
  0x18   : > { %v344_v47 = vpack.i.b16 %v343_v40, %v342_v37  ;;  %v667_v49 = vcombine.low %v470_v33, %v482_v36  ;;  %v483_v51 = vshrl.u32 %v452_v28, 16  ;;  %v484_v52 = vshrl.u32 %v461_v29, 16 }
  0x19   : > { %v571_v42 = vsel %vm413_vm0, %v565_v34, 0  ;;  %v620_v45 = vrot.slane %v613_v38, %v1738_v15  ;;  %v363_v46 = vcombine.low %v341_v35, %v353_v39  ;;  %v356_v50 = vpack.i.b16 %v355_v43, %v354_v41 }
  0x1a   : > { %1506 = vmatpush3.bf16.xpose.msra.mxu0 %v571_v42  ;;  %v485_v58 = vpack.i.b16 %v484_v52, %v483_v51  ;;  %v320_v59 = vcombine.high %v1629_v23, %v1663_v6  ;;  %v329_v60 = vcombine.high %v1630_v25, %v1663_v6  ;;  %v338_v61 = vcombine.high %v1631_v26, %v1663_v6 }
  0x1b   : > { %1517 = vmatprep.subr.bf16.mxu0 %v1660_v1  ;;  %v625_v53 = vsel %vm413_vm0, %v620_v45, 0  ;;  %v370_v54 = vrot.slane %v363_v46, %v1738_v15  ;;  %v371_v57 = vcombine.low %v344_v47, %v356_v50  ;;  %v348_v62 = vshrl.u32 %v311_v56, 16 }
  0x1c   : > { %1512 = vmatpush3.bf16.xpose.msra.mxu1 %v625_v53  ;;  %v721_v0 = vcombine.low %v473_v55, %v485_v58  ;;  %v347_v2 = vpack.i.b16 %v320_v59, %v311_v56  ;;  %v349_v3 = vshrl.u32 %v320_v59, 16  ;;  %v674_v4 = vrot.slane %v667_v49, %v1738_v15  ;;  %v1632_v55 = vld.sshfl [vmem:[%s1392_s25 + $0x40] sm:$0x33 pattern:$0x73516240] }
  0x1d   : > { %400 = vst.msk [vmem:[#allocation2] sm:$0xf] %vm399_vm2, %v370_v54  ;;  %1523 = vmatprep.subr.bf16.mxu1 %v1660_v1  ;;  %v378_v63 = vrot.slane %v371_v57, %v1738_v15  ;;  %v359_v5 = vpack.i.b16 %v338_v61, %v329_v60  ;;  %v360_v7 = vshrl.u32 %v329_v60, 16  ;;  %v361_v8 = vshrl.u32 %v338_v61, 16 }
  0x1e   : > { %v350_v10 = vpack.i.b16 %v349_v3, %v348_v62  ;;  %v728_v13 = vrot.slane %v721_v0, %v1738_v15  ;;  %v679_v14 = vsel %vm413_vm0, %v674_v4, 0  ;;  %v1665_v24 = vmov -inf   ;;  %v1633_v57 = vld.sshfl [vmem:[%s1392_s25 + $0x42] sm:$0x33 pattern:$0x73516240] }
  0x1f   : > { %401 = vst.msk [vmem:[#allocation2 + $0x4] sm:$0xf] %vm399_vm2, %v378_v63  ;;  %v379_v11 = vcombine.low %v347_v2, %v359_v5  ;;  %v362_v12 = vpack.i.b16 %v361_v8, %v360_v7  ;;  %v1634_v58 = vld.sshfl [vmem:[%s1392_s25 + $0x48] sm:$0x33 pattern:$0x73516240]  ;;  %v532_v2 = vpack.i.b16 %v1633_v57, %v1632_v55 }
  0x20   : > { %v733_v20 = vsel %vm413_vm0, %v728_v13, 0  ;;  %405 = vst.msk [vmem:[#allocation3] sm:$0xff] %vm404_vm3, %v1665_v24  ;;  %406 = vst.msk [vmem:[#allocation3 + $0x8] sm:$0xff] %vm404_vm3, %v1665_v24  ;;  %v533_v63 = vshrl.u32 %v1632_v55, 16  ;;  %v534_v3 = vshrl.u32 %v1633_v57, 16  ;;  %v545_v5 = vshrl.u32 %v1634_v58, 16 }
  0x21   : > { %v386_v16 = vrot.slane %v379_v11, %v1738_v15  ;;  %v387_v17 = vcombine.low %v350_v10, %v362_v12  ;;  %407 = vst.msk [vmem:[#allocation3 + $0x10] sm:$0xff] %vm404_vm3, %v1665_v24  ;;  %408 = vst.msk [vmem:[#allocation3 + $0x18] sm:$0xff] %vm404_vm3, %v1665_v24  ;;  %v1635_v60 = vld.sshfl [vmem:[%s1392_s25 + $0x4a] sm:$0x33 pattern:$0x73516240]  ;;  %v502_v13 = vcombine.high %v1632_v55, %v1663_v6 }
  0x22   : > { %v544_v4 = vpack.i.b16 %v1635_v60, %v1634_v58  ;;  %v546_v7 = vshrl.u32 %v1635_v60, 16  ;;  %v535_v10 = vpack.i.b16 %v534_v3, %v533_v63  ;;  %vm911_vm4 = vcmask 1043456  }
  0x23   : > { %402 = vst.msk [vmem:[#allocation2 + $0x8] sm:$0xf] %vm399_vm2, %v386_v16  ;;  %v394_v19 = vrot.slane %v387_v17, %v1738_v15  ;;  %v520_v16 = vcombine.high %v1634_v58, %v1663_v6  ;;  %v529_v17 = vcombine.high %v1635_v60, %v1663_v6  ;;  %v539_v24 = vshrl.u32 %v502_v13, 16 }
  0x24   : > { %v554_v18 = vld [vmem:[#allocation2] sm:$0xf]  ;;  %v900_v11 = vcombine.low %v532_v2, %v544_v4  ;;  %v547_v12 = vpack.i.b16 %v546_v7, %v545_v5  ;;  %vm1317_vm5 = vcmask 130048   ;;  %vm1319_vm6 = vcmask 195584  }
  0x25   : > { %1508 = vmatmul.mubr.msk.bf16.vlgmr.msra.gmra.mxu0 %vm413_vm0, %v554_v18  ;;  %403 = vst.msk [vmem:[#allocation2 + $0xc] sm:$0xf] %vm399_vm2, %v394_v19  ;;  %vm1322_vm7 = vcmask 257024  }
  0x26   : > { %1518 = vmatpush3.bf16.xpose.msra.mxu0 %v679_v14  ;;  %1519 = vmatprep.mubr.msk.bf16.mxu0 %vm1662_vm1, %v1660_v1  ;;  %v555_v21 = vld [vmem:[#allocation2 + $0x4] sm:$0xf]  ;;  %v511_v14 = vcombine.high %v1633_v57, %v1663_v6  ;;  %v907_v18 = vrot.slane %v900_v11, %v1738_v15  ;;  %v955_v19 = vcombine.low %v535_v10, %v547_v12 }
  0x27   : > { %1529 = vmatprep.subr.bf16.mxu0 %v1660_v1  ;;  %1514 = vmatmul.mubr.msk.bf16.vlgmr.msra.gmra.mxu1 %vm413_vm0, %v555_v21  ;;  %v1808_v45 = vld [vmem:[#allocation3] sm:$0xff]  ;;  %v1813_v48 = vld [vmem:[#allocation3 + $0x8] sm:$0xff]  ;;  %v550_v21 = vpack.i.b16 %v529_v17, %v520_v16 }
  0x28   : > { %1524 = vmatpush3.bf16.xpose.msra.mxu1 %v733_v20  ;;  %1525 = vmatprep.mubr.msk.bf16.mxu1 %vm1662_vm1, %v1660_v1  ;;  %v1823_v52 = vld [vmem:[#allocation3 + $0x10] sm:$0xff]  ;;  %v1837_v59 = vld [vmem:[#allocation3 + $0x18] sm:$0xff]  ;;  %v538_v20 = vpack.i.b16 %v511_v14, %v502_v13 }
  0x29   : > { %1535 = vmatprep.subr.bf16.mxu1 %v1660_v1 }
  0x2a   : > { %v556_v22 = vld [vmem:[#allocation2 + $0x8] sm:$0xf] }
  0x2c   : > { %v557_v23 = vld [vmem:[#allocation2 + $0xc] sm:$0xf] }
  0x2d   : > { %1520 = vmatmul.mubr.msk.bf16.vlgmr.msra.gmra.mxu0 %vm413_vm0, %v556_v22  ;;  %v913_v22 = vsel %vm911_vm4, %v907_v18, 0  ;;  %v842_v18 = vld [vmem:[#allocation4 + $0x18] sm:$0xff] }
  0x2e   : > { %1531 = vmatprep.mubr.msk.bf16.mxu0 %vm1662_vm1, %v1660_v1  ;;  %1530 = vmatpush3.bf16.msra.mxu0 %v913_v22 }
  0x2f   : > { %1526 = vmatmul.mubr.msk.bf16.vlgmr.msra.gmra.mxu1 %vm413_vm0, %v557_v23  ;;  %v962_v23 = vrot.slane %v955_v19, %v1738_v15  ;;  %1541 = vmatprep.subr.bf16.mxu0 %v1660_v1 }
  0x30   : > { %1537 = vmatprep.mubr.msk.bf16.mxu1 %vm1662_vm1, %v1660_v1 }
  0xe5   : > { %v1792_v25 = vpop.f32.mrf.mxu0 }
  0xe6   : > { %v779_v26 = vsel %vm413_vm0, %v1792_v25, -inf }
  0xe7   : > { %780 = vmax.xlane.f32.xlu0 %v779_v26  ;;  %v1509_v27 = vpop.f32.mrf.mxu0  ;;  %v1796_v28 = vpop.f32.mrf.mxu1  ;;  %v540_v26 = vshrl.u32 %v511_v14, 16 }
  0xe8   : > { %v782_v30 = vsel %vm413_vm0, %v1796_v28, -inf  ;;  %v1009_v27 = vcombine.low %v538_v20, %v550_v21 }
  0xe9   : > { %v610_v29 = vpop.f32.mrf.mxu0  ;;  %v1515_v31 = vpop.f32.mrf.mxu1  ;;  %v541_v6 = vpack.i.b16 %v540_v26, %v539_v24 }
  0xea   : > { %v551_v29 = vshrl.u32 %v520_v16, 16  ;;  %v967_v31 = vsel %vm911_vm4, %v962_v23, 0  ;;  %v840_v16 = vld [vmem:[#allocation4 + $0x8] sm:$0xff] }
  0xeb   : > { %783 = vmax.xlane.f32.xlu0 %v782_v30  ;;  %v1510_v32 = vpop.f32.mrf.mxu0  ;;  %v664_v33 = vpop.f32.mrf.mxu1  ;;  %v552_v30 = vshrl.u32 %v529_v17, 16  ;;  %1536 = vmatpush3.bf16.msra.mxu1 %v967_v31 }
  0xec   : > { %v1016_v32 = vrot.slane %v1009_v27, %v1738_v15  ;;  %1547 = vmatprep.subr.bf16.mxu1 %v1660_v1 }
  0xed   : > { %v1800_v34 = vpop.f32.mrf.mxu0  ;;  %v1516_v35 = vpop.f32.mrf.mxu1  ;;  %v553_v33 = vpack.i.b16 %v552_v30, %v551_v29 }
  0xee   : > { %v785_v36 = vsel %vm413_vm0, %v1800_v34, -inf  ;;  %v1021_v35 = vsel %vm911_vm4, %v1016_v32, 0 }
  0xef   : > { %786 = vmax.xlane.f32.xlu1 %v785_v36  ;;  %v1521_v37 = vpop.f32.mrf.mxu0  ;;  %v1804_v38 = vpop.f32.mrf.mxu1  ;;  %v1063_v36 = vcombine.low %v541_v6, %v553_v33  ;;  %v868_v33 = vld [vmem:[#allocation5] sm:$0xff] }
  0xf0   : > { %v788_v40 = vsel %vm413_vm0, %v1804_v38, -inf }
  0xf1   : > { %v718_v39 = vpop.f32.mrf.mxu0  ;;  %v1527_v41 = vpop.f32.mrf.mxu1  ;;  %v1070_v37 = vrot.slane %v1063_v36, %v1738_v15  ;;  %v869_v36 = vld [vmem:[#allocation5 + $0x8] sm:$0xff] }
  0xf3   : > { %789 = vmax.xlane.f32.xlu1 %v788_v40  ;;  %v1522_v42 = vpop.f32.mrf.mxu0  ;;  %v772_v43 = vpop.f32.mrf.mxu1  ;;  %v1075_v39 = vsel %vm911_vm4, %v1070_v37, 0 }
  0xf5   : > { %v1528_v44 = vpop.f32.mrf.mxu1 }
 0x170   : > { %v781_v46 = vpop.xlane.xlu0 %780 }
 0x171   : > { %v1811_v47 = vmax.f32 %v1808_v45, %v781_v46 }
 0x173   : > { %v795_v49 = vsub.f32 %v1808_v45, %v1811_v47  ;;  %1125 = vst.msk [vmem:[#allocation3] sm:$0xff] %vm404_vm3, %v1811_v47  ;;  %809 = vperm.xlu0 %1586, %v1811_v47  }
 0x174   : > { %v784_v50 = vpop.xlane.xlu0 %783 }
 0x175   : > { %v1821_v51 = vmax.f32 %v1813_v48, %v784_v50  ;;  %v799_v10 = vmul.f32 1.442695, %v795_v49 }
 0x177   : > { %v796_v53 = vsub.f32 %v1813_v48, %v1821_v51  ;;  %1126 = vst.msk [vmem:[#allocation3 + $0x8] sm:$0xff] %vm404_vm3, %v1821_v51  ;;  %814 = vperm.xlu1 %1587, %v1821_v51  }
 0x178   : > { %v787_v54 = vpop.xlane.xlu1 %786 }
 0x179   : > { %v1835_v56 = vmax.f32 %v1823_v52, %v787_v54  ;;  %v801_v5 = vmul.f32 1.442695, %v796_v53  ;;  %v839_v53 = vld [vmem:[#allocation4] sm:$0xff] }
 0x17b   : > { %v797_v61 = vsub.f32 %v1823_v52, %v1835_v56  ;;  %1127 = vst.msk [vmem:[#allocation3 + $0x10] sm:$0xff] %vm404_vm3, %v1835_v56  ;;  %819 = vperm.xlu1 %1587, %v1835_v56  }
 0x17c   : > { %v790_v62 = vpop.xlane.xlu1 %789 }
 0x17d   : > { %v1845_v0 = vmax.f32 %v1837_v59, %v790_v62 }
 0x17f   : > { %v798_v8 = vsub.f32 %v1837_v59, %v1845_v0  ;;  %1128 = vst.msk [vmem:[#allocation3 + $0x18] sm:$0xff] %vm404_vm3, %v1845_v0  ;;  %824 = vperm.xlu1 %1587, %v1845_v0   ;;  %v841_v59 = vld [vmem:[#allocation4 + $0x10] sm:$0xff] }
 0x181   : > { %v805_v48 = vmul.f32 1.442695, %v798_v8 }
 0x1ee   : > { %v810_v40 = vpop.permute.xlu0 %809 }
 0x1ef   : > { %v827_v41 = vsub.f32 %v1792_v25, %v810_v40 }
 0x1f1   : > { %v831_v42 = vmul.f32 1.442695, %v827_v41 }
 0x1f2   : > { %v815_v43 = vpop.permute.xlu1 %814 }
 0x1f3   : > { %1600 = vpow2.f32 %v831_v42  ;;  %v828_v44 = vsub.f32 %v1796_v28, %v815_v43 }
 0x1f5   : > { %v833_v46 = vmul.f32 1.442695, %v828_v44  ;;  %v870_v44 = vld [vmem:[#allocation5 + $0x10] sm:$0xff] }
 0x1f6   : > { %v820_v50 = vpop.permute.xlu1 %819 }
 0x1f7   : > { %1602 = vpow2.f32 %v833_v46  ;;  %v829_v54 = vsub.f32 %v1800_v34, %v820_v50 }
 0x1f9   : > { %v835_v55 = vmul.f32 1.442695, %v829_v54 }
 0x1fa   : > { %v825_v57 = vpop.permute.xlu1 %824 }
 0x1fb   : > { %1604 = vpow2.f32 %v835_v55  ;;  %v830_v58 = vsub.f32 %v1804_v38, %v825_v57 }
 0x1fd   : > { %v837_v60 = vmul.f32 1.442695, %v830_v58 }
 0x1ff   : > { %1606 = vpow2.f32 %v837_v60 }
 0x200   : > { %v1601_v62 = vpop.eup %1600  ;;  %1608 = vpow2.f32 %v801_v5 }
 0x201   : > { %v847_v25 = vsel %vm413_vm0, %v1601_v62, 0.0  ;;  %v896_v63 = vpack.c.bf16 %v1601_v62, %v1601_v62  ;;  %1610 = vpow2.f32 %v799_v10  ;;  %v871_v62 = vld [vmem:[#allocation5 + $0x18] sm:$0xff] }
 0x202   : > { %848 = vadd.xlane.f32.xlu1 %v847_v25 }
 0x203   : > { %1532 = vmatmul.mubr.msk.bf16.vlgmr.msra.gmra.mxu0 %vm413_vm0, %v896_v63 }
 0x204   : > { %v1603_v28 = vpop.eup %1602  ;;  %1542 = vmatpush3.bf16.msra.mxu0 %v1021_v35  ;;  %1543 = vmatprep.mubr.msk.bf16.mxu0 %vm1662_vm1, %v1660_v1 }
 0x205   : > { %v850_v34 = vsel %vm413_vm0, %v1603_v28, 0.0  ;;  %v897_v2 = vpack.c.bf16 %v1603_v28, %v1603_v28 }
 0x206   : > { %851 = vadd.xlane.f32.xlu0 %v850_v34 }
 0x207   : > { %1538 = vmatmul.mubr.msk.bf16.vlgmr.msra.gmra.mxu1 %vm413_vm0, %v897_v2 }
 0x208   : > { %v1605_v38 = vpop.eup %1604  ;;  %1548 = vmatpush3.bf16.msra.mxu1 %v1075_v39  ;;  %1549 = vmatprep.mubr.msk.bf16.mxu1 %vm1662_vm1, %v1660_v1  ;;  %v803_v1 = vmul.f32 1.442695, %v797_v61 }
 0x209   : > { %v853_v3 = vsel %vm413_vm0, %v1605_v38, 0.0  ;;  %v898_v4 = vpack.c.bf16 %v1605_v38, %v1605_v38 }
 0x20a   : > { %854 = vadd.xlane.f32.xlu1 %v853_v3  ;;  %1612 = vpow2.f32 %v803_v1 }
 0x20b   : > { %1544 = vmatmul.mubr.msk.bf16.vlgmr.msra.gmra.mxu0 %vm413_vm0, %v898_v4  ;;  %1614 = vpow2.f32 %v805_v48 }
 0x20c   : > { %v1607_v7 = vpop.eup %1606 }
 0x20d   : > { %v856_v11 = vsel %vm413_vm0, %v1607_v7, 0.0  ;;  %v899_v12 = vpack.c.bf16 %v1607_v7, %v1607_v7  ;;  %v1609_v45 = vpop.eup %1608 }
 0x20e   : > { %857 = vadd.xlane.f32.xlu1 %v856_v11  ;;  %v1611_v47 = vpop.eup %1610  ;;  %v844_v56 = vmul.f32 %v1609_v45, %v840_v16 }
 0x20f   : > { %1550 = vmatmul.mubr.msk.bf16.vlgmr.msra.gmra.mxu1 %vm413_vm0, %v899_v12  ;;  %v843_v13 = vmul.f32 %v1611_v47, %v839_v53 }
 0x217   : > { %v1613_v49 = vpop.eup %1612 }
 0x218   : > { %v1615_v51 = vpop.eup %1614  ;;  %v845_v8 = vmul.f32 %v1613_v49, %v841_v59 }
 0x219   : > { %v846_v21 = vmul.f32 %v1615_v51, %v842_v18 }
 0x21c   : > { %879 = vperm.xlu0 %1586, %v1609_v45  }
 0x21f   : > { %874 = vperm.xlu1 %1587, %v1611_v47  }
 0x223   : > { %884 = vperm.xlu1 %1587, %v1613_v49  }
 0x227   : > { %889 = vperm.xlu1 %1587, %v1615_v51  }
 0x28b   : > { %v849_v14 = vpop.xlane.xlu1 %848 }
 0x28c   : > { %v859_v52 = vadd.f32 %v849_v14, %v843_v13 }
 0x28e   : > { %864 = vst.msk [vmem:[#allocation4] sm:$0xff] %vm404_vm3, %v859_v52 }
 0x28f   : > { %v852_v61 = vpop.xlane.xlu0 %851 }
 0x290   : > { %v860_v0 = vadd.f32 %v852_v61, %v844_v56 }
 0x292   : > { %865 = vst.msk [vmem:[#allocation4 + $0x8] sm:$0xff] %vm404_vm3, %v860_v0 }
 0x293   : > { %v855_v17 = vpop.xlane.xlu1 %854 }
 0x294   : > { %v861_v19 = vadd.f32 %v855_v17, %v845_v8 }
 0x295   : > { %v1136_v20 = vld [vmem:[#allocation4] sm:$0xff] }
 0x296   : > { %866 = vst.msk [vmem:[#allocation4 + $0x10] sm:$0xff] %vm404_vm3, %v861_v19  ;;  %1616 = vrcp.f32 %v1136_v20 }
 0x297   : > { %v858_v22 = vpop.xlane.xlu1 %857  ;;  %v880_v37 = vpop.permute.xlu0 %879 }
 0x298   : > { %v862_v23 = vadd.f32 %v858_v22, %v846_v21  ;;  %v893_v43 = vmul.f32 %v880_v37, %v869_v36 }
 0x299   : > { %v1137_v24 = vld [vmem:[#allocation4 + $0x8] sm:$0xff] }
 0x29a   : > { %867 = vst.msk [vmem:[#allocation4 + $0x18] sm:$0xff] %vm404_vm3, %v862_v23  ;;  %1618 = vrcp.f32 %v1137_v24 }
 0x29b   : > { %v875_v32 = vpop.permute.xlu1 %874 }
 0x29c   : > { %v892_v35 = vmul.f32 %v875_v32, %v868_v33 }
 0x29d   : > { %v1138_v26 = vld [vmem:[#allocation4 + $0x10] sm:$0xff] }
 0x29e   : > { %1620 = vrcp.f32 %v1138_v26 }
 0x29f   : > { %v885_v40 = vpop.permute.xlu1 %884 }
 0x2a0   : > { %v894_v58 = vmul.f32 %v885_v40, %v870_v44 }
 0x2a1   : > { %v1139_v27 = vld [vmem:[#allocation4 + $0x18] sm:$0xff] }
 0x2a2   : > { %1622 = vrcp.f32 %v1139_v27 }
 0x2a3   : > { %v1617_v29 = vpop.eup %1616  ;;  %v890_v60 = vpop.permute.xlu1 %889 }
 0x2a4   : > { %1146 = vperm.xlu1 %1587, %v1617_v29   ;;  %v895_v38 = vmul.f32 %v890_v60, %v871_v62 }
 0x2a7   : > { %v1619_v30 = vpop.eup %1618 }
 0x2a8   : > { %1151 = vperm.xlu0 %1586, %v1619_v30  }
 0x2ab   : > { %v1621_v31 = vpop.eup %1620 }
 0x2ac   : > { %1156 = vperm.xlu1 %1587, %v1621_v31  }
 0x2af   : > { %v1623_v6 = vpop.eup %1622 }
 0x2b0   : > { %1161 = vperm.xlu0 %1586, %v1623_v6  }
 0x2c3   : > { %v949_v39 = vpop.f32.mrf.mxu0 }
 0x2c4   : > { %v1117_v41 = vadd.f32 %v949_v39, %v892_v35 }
 0x2c5   : > { %v1533_v42 = vpop.f32.mrf.mxu0 }
 0x2c6   : > { %1121 = vst.msk [vmem:[#allocation5] sm:$0xff] %vm413_vm0, %v1117_v41 }
 0x2c7   : > { %v952_v46 = vpop.f32.mrf.mxu0  ;;  %v1003_v50 = vpop.f32.mrf.mxu1 }
 0x2c8   : > { %v1118_v54 = vadd.f32 %v1003_v50, %v893_v43 }
 0x2c9   : > { %v1534_v55 = vpop.f32.mrf.mxu0  ;;  %v1539_v57 = vpop.f32.mrf.mxu1 }
 0x2ca   : > { %1122 = vst.msk [vmem:[#allocation5 + $0x8] sm:$0xff] %vm413_vm0, %v1118_v54 }
 0x2cb   : > { %v1006_v25 = vpop.f32.mrf.mxu1  ;;  %v1057_v63 = vpop.f32.mrf.mxu0 }
 0x2cc   : > { %v1119_v28 = vadd.f32 %v1057_v63, %v894_v58 }
 0x2cd   : > { %v1540_v34 = vpop.f32.mrf.mxu1  ;;  %v1545_v2 = vpop.f32.mrf.mxu0  ;;  %v1132_v51 = vld [vmem:[#allocation5] sm:$0xff] }
 0x2ce   : > { %1123 = vst.msk [vmem:[#allocation5 + $0x10] sm:$0xff] %vm413_vm0, %v1119_v28 }
 0x2cf   : > { %v1060_v3 = vpop.f32.mrf.mxu0  ;;  %v1111_v4 = vpop.f32.mrf.mxu1 }
 0x2d0   : > { %v1120_v5 = vadd.f32 %v1111_v4, %v895_v38 }
 0x2d1   : > { %v1546_v7 = vpop.f32.mrf.mxu0  ;;  %v1551_v10 = vpop.f32.mrf.mxu1  ;;  %v1133_v13 = vld [vmem:[#allocation5 + $0x8] sm:$0xff] }
 0x2d2   : > { %1124 = vst.msk [vmem:[#allocation5 + $0x18] sm:$0xff] %vm413_vm0, %v1120_v5 }
 0x2d3   : > { %v1114_v11 = vpop.f32.mrf.mxu1 }
 0x2d5   : > { %v1552_v12 = vpop.f32.mrf.mxu1  ;;  %v1134_v47 = vld [vmem:[#allocation5 + $0x10] sm:$0xff] }
 0x2d9   : > { %v1135_v16 = vld [vmem:[#allocation5 + $0x18] sm:$0xff] }
 0x31f   : > { %v1147_v1 = vpop.permute.xlu1 %1146 }
 0x320   : > { %v1164_v53 = vmul.f32 %v1147_v1, %v1132_v51 }
 0x323   : > { %v1152_v48 = vpop.permute.xlu0 %1151 }
 0x324   : > { %v1165_v52 = vmul.f32 %v1152_v48, %v1133_v13 }
 0x327   : > { %v1157_v45 = vpop.permute.xlu1 %1156 }
 0x328   : > { %v1166_v49 = vmul.f32 %v1157_v45, %v1134_v47 }
 0x32a   : > { %v1168_v56 = vcombine.low %v1164_v53, %v1166_v49  ;;  %v1169_v61 = vcombine.high %v1164_v53, %v1166_v49 }
 0x32b   : > { %v1162_v14 = vpop.permute.xlu0 %1161 }
 0x32c   : > { %v1167_v59 = vmul.f32 %v1162_v14, %v1135_v16  ;;  %v1176_v17 = vrot.slane %v1168_v56, %v1738_v15  ;;  %v1183_v18 = vrot.slane %v1169_v61, %v1738_v15 }
 0x32e   : > { %v1184_v0 = vcombine.low %v1165_v52, %v1167_v59  ;;  %v1185_v8 = vcombine.high %v1165_v52, %v1167_v59 }
 0x330   : > { %v1192_v19 = vrot.slane %v1184_v0, %v1738_v15  ;;  %v1199_v20 = vrot.slane %v1185_v8, %v1738_v15 }
 0x332   : > { %v1200_v21 = vcombine.low %v1176_v17, %v1192_v19  ;;  %v1201_v22 = vcombine.high %v1176_v17, %v1192_v19  ;;  %v1216_v23 = vcombine.low %v1183_v18, %v1199_v20  ;;  %v1217_v24 = vcombine.high %v1183_v18, %v1199_v20 }
 0x334   : > { %v1208_v26 = vrot.slane %v1200_v21, %v1732_v9  ;;  %v1215_v27 = vrot.slane %v1201_v22, %v1732_v9  ;;  %v1224_v29 = vrot.slane %v1216_v23, %v1732_v9  ;;  %v1231_v30 = vrot.slane %v1217_v24, %v1732_v9 }
 0x336   : > { %v1236_v31 = vcombine.low %v1208_v26, %v1215_v27  ;;  %v1482_v6 = vcombine.high %v1208_v26, %v1215_v27  ;;  %v1252_v32 = vcombine.low %v1224_v29, %v1231_v30  ;;  %v1483_v33 = vcombine.high %v1224_v29, %v1231_v30 }
 0x338   : > { %v1243_v35 = vrot.slane %v1236_v31, %v1738_v15  ;;  %v1251_v36 = vrot.slane %v1482_v6, %v1738_v15  ;;  %v1259_v37 = vrot.slane %v1252_v32, %v1738_v15  ;;  %v1267_v39 = vrot.slane %v1483_v33, %v1738_v15 }
 0x33a   : > { %v1269_v40 = vcombine.high %v1243_v35, %v1251_v36  ;;  %v1285_v41 = vcombine.high %v1259_v37, %v1267_v39  ;;  %v1268_v42 = vcombine.low %v1243_v35, %v1251_v36  ;;  %v1284_v43 = vcombine.low %v1259_v37, %v1267_v39 }
 0x33c   : > { %v1283_v44 = vrot.slane %v1269_v40, %v1732_v9  ;;  %v1299_v46 = vrot.slane %v1285_v41, %v1732_v9  ;;  %v1276_v50 = vrot.slane %v1268_v42, %v1732_v9  ;;  %v1292_v54 = vrot.slane %v1284_v43, %v1732_v9 }
 0x33e   : > { %v1302_v55 = vcombine.low %v1283_v44, %v1299_v46  ;;  %v1301_v57 = vcombine.high %v1276_v50, %v1292_v54  ;;  %v1300_v58 = vcombine.low %v1276_v50, %v1292_v54  ;;  %v1303_v15 = vcombine.high %v1283_v44, %v1299_v46 }
 0x340   : > { %1309 = vrot.lane.b32.xlu0 %v1302_v55, %s1666_s26  ;;  %1305 = vrot.lane.b32.xlu1 %v1301_v57, %s1667_s27 }
 0x344   : > { %1313 = vrot.lane.b32.xlu1 %v1303_v15, %s1668_s28 }
 0x3b2   : > { %v1306_v60 = vpop.permute.xlu1 %1305  ;;  %v1310_v62 = vpop.permute.xlu0 %1309 }
 0x3b3   : > { %v1316_v25 = vsel %vm413_vm0, %v1300_v58, %v1306_v60 }
 0x3b4   : > { %v1318_v28 = vsel %vm1317_vm5, %v1316_v25, %v1310_v62 }
 0x3b6   : > { %v1314_v63 = vpop.permute.xlu1 %1313 }
 0x3b7   : > { %v1320_v9 = vsel %vm1319_vm6, %v1318_v28, %v1314_v63 }
 0x3b8   : > { %v1321_v34 = vpack.c.bf16 %v1320_v9, %v1320_v9 }
 0x3ba   : > { %1323 = vst.msk [vmem:[%s289_s5] sm:$0xf] %vm1322_vm7, %v1321_v34 }
 0x3bb PF: > { %s13_s14 = sadd.s32 1, %s1658_s14   ;;  %s1936_s12 = smov %s1654_s13 }
 0x3bc   : > { %p10_p5 = scmp.ge.s32.totalorder %s13_s14, 4   ;;  %s1937_s13 = smov %s1939_s15 }
 0x3be   :  { %12 = sbr.rel (!%p10_p5) target bundleno = 2 (0x2), region = 76 }

</bundles_post_ra>
